<compile_context>
chip_gen: v7x
topology: tpu7x:2x2x1
jax: 0.10.0
libtpu: 0.0.40
codegen_flags: <defaults>
</compile_context>

<pallas_src>
import functools

import jax
import jax.numpy as jnp
from jax.experimental import pallas as pl
from jax.experimental.pallas import tpu as pltpu


def _round_up(a, b):
    return ((a + b - 1) // b) * b


def _vmem_budget_bytes():
    """Physical VMEM capacity (generation-aware); conservative v7x fallback."""
    try:
        return int(pltpu.get_tpu_info().vmem_capacity_bytes)
    except Exception:
        return 64 * 1024 * 1024


def _num_tensorcores_per_chip():
    """Best-effort TC count per chip (v7x has 2); only a block-splitting hint."""
    try:
        kind = jax.devices()[0].device_kind.lower()
    except Exception:
        return 1
    return 2 if "v7" in kind else 1


def _pick_ff_chunk(d_ff):
    """d_ff streaming chunk: full array if small, else a 128-multiple divisor."""
    if d_ff <= 2048:
        return d_ff
    for tk in (2048, 1024, 512, 256, 128):
        if d_ff % tk == 0:
            return tk
    return d_ff


def _ffn_kernel(x_ref, w1_ref, b1_ref, w2_ref, p_ref, o_ref, acc_ref, *, eps):
    k = pl.program_id(1)

    @pl.when(k == 0)
    def _init():
        acc_ref[...] = jnp.zeros_like(acc_ref)

    # linear1 for this d_ff chunk + bias + ReLU.  The chunk of h is complete
    # (reduction is over d_input, not tiled), so bias/ReLU per-chunk is exact.
    # Operands stay in native dtype (bf16 -> bf16 MXU); accumulate in f32.
    h = jnp.dot(x_ref[...], w1_ref[...], preferred_element_type=jnp.float32)
    h = jnp.maximum(h + b1_ref[...].astype(jnp.float32), 0.0)

    # Partial linear2: accumulate the d_ff reduction into the f32 scratch.
    w2 = w2_ref[...]
    acc_ref[...] += jnp.dot(h.astype(w2.dtype), w2,
                            preferred_element_type=jnp.float32)

    @pl.when(k == pl.num_programs(1) - 1)
    def _finalize():
        # Param rows: 0=b2, 1=gamma1, 2=beta1, 3=gamma2, 4=beta2
        p = p_ref[...].astype(jnp.float32)
        y = acc_ref[...] + p[0:1, :]
        inv_d = 1.0 / y.shape[-1]

        # LayerNorm 1 (biased variance, matches nn.LayerNorm); reuse centered y.
        mu1 = jnp.sum(y, axis=-1, keepdims=True) * inv_d
        yc = y - mu1
        var1 = jnp.sum(yc * yc, axis=-1, keepdims=True) * inv_d
        z = yc * jax.lax.rsqrt(var1 + eps) * p[1:2, :] + p[2:3, :]

        # LayerNorm 2
        mu2 = jnp.sum(z, axis=-1, keepdims=True) * inv_d
        zc = z - mu2
        var2 = jnp.sum(zc * zc, axis=-1, keepdims=True) * inv_d
        out = zc * jax.lax.rsqrt(var2 + eps) * p[3:4, :] + p[4:5, :]

        o_ref[...] = out.astype(o_ref.dtype)


def feed_forward(x, w1, b1, w2, b2, gamma1, beta1, gamma2, beta2, *, eps=1e-5):
    """Fused FeedForward forward pass (inference).

    x:  (..., d_input)
    w1: (d_input, d_ff)   b1: (d_ff,)
    w2: (d_ff, d_model)   b2: (d_model,)
    gamma1/beta1/gamma2/beta2: (d_model,)
    returns: (..., d_model)
    """
    d_input = x.shape[-1]
    d_ff = w1.shape[1]
    d_model = w2.shape[1]
    lead_shape = x.shape[:-1]

    x2 = x.reshape(-1, d_input)
    n = x2.shape[0]
    itemsize = jnp.dtype(x.dtype).itemsize

    tk = _pick_ff_chunk(d_ff)
    num_k = d_ff // tk

    budget = _vmem_budget_bytes()
    n_cores = _num_tensorcores_per_chip()

    def vmem_estimate(block_rows):
        # double-buffered streamed tiles + resident accumulator / params
        streamed = 2 * (block_rows * d_input + d_input * tk + tk
                        + tk * d_model + block_rows * d_model) * itemsize
        resident = block_rows * d_model * 4 + 8 * max(d_model, 128) * itemsize
        return streamed + resident

    # Largest power-of-two row block (multiple of 8, <= 1024) fitting ~half VMEM.
    block_rows = 1024
    while block_rows > 8 and vmem_estimate(block_rows) > budget // 2:
        block_rows //= 2

    if n <= block_rows:
        # Whole problem fits in one row block.  On a 2-TC chip (v7x) split into
        # two blocks so the "parallel" axis shards across cores; single-TC
        # chips keep one big block (no per-step overhead).
        if n_cores > 1 and n >= 16 and n % 2 == 0 and (n // 2) % 8 == 0:
            block_rows = n // 2
        else:
            block_rows = n   # full-dim block; no 8-row padding needed

    n_pad = _round_up(n, block_rows)
    if n_pad != n:
        # Fallback only for awkward row counts; padded rows are row-local
        # garbage and sliced off below.
        x2 = jnp.pad(x2, ((0, n_pad - n), (0, 0)))
    num_row_blocks = n_pad // block_rows

    b1r = b1.reshape(1, d_ff)
    # Stack the five (d_model,) parameter vectors into one (5, d_model) tile:
    # one DMA instead of five padded (8,128) tiles.
    params = jnp.stack([b2, gamma1, beta1, gamma2, beta2], axis=0)

    kernel = functools.partial(_ffn_kernel, eps=eps)

    grid_spec = pltpu.PrefetchScalarGridSpec(
        num_scalar_prefetch=0,
        grid=(num_row_blocks, num_k),
        in_specs=[
            pl.BlockSpec((block_rows, d_input), lambda i, k: (i, 0)),  # x rows
            pl.BlockSpec((d_input, tk), lambda i, k: (0, k)),          # w1 chunk
            pl.BlockSpec((1, tk), lambda i, k: (0, k)),                # b1 chunk
            pl.BlockSpec((tk, d_model), lambda i, k: (k, 0)),          # w2 chunk
            pl.BlockSpec((5, d_model), lambda i, k: (0, 0)),           # b2 + LN params
        ],
        out_specs=pl.BlockSpec((block_rows, d_model), lambda i, k: (i, 0)),
        scratch_shapes=[pltpu.VMEM((block_rows, d_model), jnp.float32)],
    )

    est_bytes = vmem_estimate(block_rows)
    vmem_limit = int(min(budget - (4 << 20),
                         max(2 * est_bytes + (4 << 20), 32 << 20)))

    cost = pl.CostEstimate(
        flops=2 * n_pad * (d_input * d_ff + d_ff * d_model),
        transcendentals=2 * n_pad,   # two rsqrt per row
        bytes_accessed=itemsize * (n_pad * d_input + d_input * d_ff + d_ff
                                   + d_ff * d_model + 5 * d_model
                                   + n_pad * d_model),
    )

    out = pl.pallas_call(
        kernel,
        out_shape=jax.ShapeDtypeStruct((n_pad, d_model), x.dtype),
        grid_spec=grid_spec,
        compiler_params=pltpu.CompilerParams(
            dimension_semantics=("parallel", "arbitrary"),
            vmem_limit_bytes=vmem_limit),
        cost_estimate=cost,
    )(x2, w1, b1r, w2, params)

    if n_pad != n:
        out = out[:n]
    return out.reshape(*lead_shape, d_model)


def _reference(x, w1, b1, w2, b2, g1, be1, g2, be2, eps=1e-5):
    h = jnp.maximum(x @ w1 + b1, 0.0)
    y = h @ w2 + b2

    def ln(v, g, b):
        mu = v.mean(-1, keepdims=True)
        var = ((v - mu) ** 2).mean(-1, keepdims=True)
        return (v - mu) * jax.lax.rsqrt(var + eps) * g + b

    return ln(ln(y, g1, be1), g2, be2)


if __name__ == "__main__":
    # Module config: d_input=32, d_model=32, dim_feedforward=64, dropout=0.0
    # (inference). Input: (batch=2, seq=8, d_input=32).
    B, S = 2, 8
    D_IN, D_MODEL, D_FF = 32, 32, 64
    EPS = 1e-5

    key = jax.random.PRNGKey(0)
    kx, k1, kb1, k2, kb2 = jax.random.split(key, 5)

    x = jax.random.normal(kx, (B, S, D_IN), dtype=jnp.float32)

    # Xavier-uniform-style weights (as in the module's _reset_parameters),
    # small uniform biases, default LayerNorm affine params.
    bound1 = (6.0 / (D_IN + D_FF)) ** 0.5
    bound2 = (6.0 / (D_FF + D_MODEL)) ** 0.5
    w1 = jax.random.uniform(k1, (D_IN, D_FF), jnp.float32, -bound1, bound1)
    b1 = jax.random.uniform(kb1, (D_FF,), jnp.float32, -0.1, 0.1)
    w2 = jax.random.uniform(k2, (D_FF, D_MODEL), jnp.float32, -bound2, bound2)
    b2 = jax.random.uniform(kb2, (D_MODEL,), jnp.float32, -0.1, 0.1)
    gamma1 = jnp.ones((D_MODEL,), jnp.float32)
    beta1 = jnp.zeros((D_MODEL,), jnp.float32)
    gamma2 = jnp.ones((D_MODEL,), jnp.float32)
    beta2 = jnp.zeros((D_MODEL,), jnp.float32)

    out = feed_forward(x, w1, b1, w2, b2, gamma1, beta1, gamma2, beta2, eps=EPS)
    out = jax.block_until_ready(out)

    ref = _reference(x, w1, b1, w2, b2, gamma1, beta1, gamma2, beta2, eps=EPS)

    assert out.shape == (B, S, D_MODEL)
    # Tolerance covers TPU default-precision f32 matmul differences between the
    # XLA reference and the MXU kernel; structural bugs give errors O(1).
    err = float(jnp.max(jnp.abs(out - ref)))
    assert jnp.allclose(out, ref, atol=2e-2, rtol=2e-2), err
    print("KERNEL_OK")
</pallas_src>

<mosaic_0001>
module attributes {stable_mosaic.version = 11 : i64} {
  func.func @_ffn_kernel(%arg0: i32, %arg1: i32, %arg2: memref<16x32xf32, #tpu.memory_space<vmem>>, %arg3: memref<32x64xf32, #tpu.memory_space<vmem>>, %arg4: memref<1x64xf32, #tpu.memory_space<vmem>>, %arg5: memref<64x32xf32, #tpu.memory_space<vmem>>, %arg6: memref<5x32xf32, #tpu.memory_space<vmem>>, %arg7: memref<16x32xf32, #tpu.memory_space<vmem>>, %arg8: memref<16x32xf32, #tpu.memory_space<vmem>>) attributes {dimension_semantics = [#tpu.dimension_semantics<parallel>, #tpu.dimension_semantics<arbitrary>], iteration_bounds = array<i64: 1, 1>, scalar_prefetch = 0 : i64, scratch_operands = 1 : i64, tpu.core_type = #tpu.core_type<tc>, window_params = [{transform_indices = @transform_0, window_bounds = array<i64: 16, 32>}, {transform_indices = @transform_1, window_bounds = array<i64: 32, 64>}, {transform_indices = @transform_2, window_bounds = array<i64: 1, 64>}, {transform_indices = @transform_3, window_bounds = array<i64: 64, 32>}, {pipeline_mode = #tpu.pipeline_mode<synchronous>, transform_indices = @transform_4, window_bounds = array<i64: 5, 32>}, {transform_indices = @transform_5, window_bounds = array<i64: 16, 32>}]} {
    %c0_i32 = arith.constant 0 : i32
    %0 = arith.cmpi eq, %arg1, %c0_i32 : i32
    %1 = arith.extui %0 : i1 to i32
    %c0_i32_0 = arith.constant 0 : i32
    %2 = arith.cmpi ne, %1, %c0_i32_0 : i32
    scf.if %2 {
      %cst_16 = arith.constant 0.000000e+00 : f32
      %19 = vector.broadcast %cst_16 : f32 to vector<16x32xf32>
      %c0_17 = arith.constant 0 : index
      %c0_18 = arith.constant 0 : index
      %20 = vector.load %arg8[%c0_17, %c0_18] : memref<16x32xf32, #tpu.memory_space<vmem>>, vector<16x32xf32>
      tpu.vector_store %arg8[%c0_17, %c0_18], %19 {strides = array<i32>} : memref<16x32xf32, #tpu.memory_space<vmem>>, vector<16x32xf32>,
    } else {
    }
    %c0 = arith.constant 0 : index
    %c0_1 = arith.constant 0 : index
    %3 = vector.load %arg2[%c0, %c0_1] : memref<16x32xf32, #tpu.memory_space<vmem>>, vector<16x32xf32>
    %c0_2 = arith.constant 0 : index
    %c0_3 = arith.constant 0 : index
    %4 = vector.load %arg3[%c0_2, %c0_3] : memref<32x64xf32, #tpu.memory_space<vmem>>, vector<32x64xf32>
    %cst = arith.constant dense<0.000000e+00> : vector<16x64xf32>
    %5 = tpu.matmul %3, %4, %cst {dimension_numbers = #tpu.dot_dimension_numbers<[1], [0], [0], [1], [0, 0, 1, 1], [], []>} : vector<16x32xf32>, vector<32x64xf32>, vector<16x64xf32> -> vector<16x64xf32>
    %c0_4 = arith.constant 0 : index
    %c0_5 = arith.constant 0 : index
    %6 = vector.load %arg4[%c0_4, %c0_5] : memref<1x64xf32, #tpu.memory_space<vmem>>, vector<1x64xf32>
    %7 = vector.broadcast %6 : vector<1x64xf32> to vector<16x64xf32>
    %8 = arith.addf %5, %7 : vector<16x64xf32>
    %cst_6 = arith.constant 0.000000e+00 : f32
    %9 = vector.broadcast %cst_6 : f32 to vector<16x64xf32>
    %10 = arith.maximumf %8, %9 : vector<16x64xf32>
    %c0_7 = arith.constant 0 : index
    %c0_8 = arith.constant 0 : index
    %11 = vector.load %arg5[%c0_7, %c0_8] : memref<64x32xf32, #tpu.memory_space<vmem>>, vector<64x32xf32>
    %c0_9 = arith.constant 0 : index
    %c0_10 = arith.constant 0 : index
    %12 = vector.load %arg8[%c0_9, %c0_10] : memref<16x32xf32, #tpu.memory_space<vmem>>, vector<16x32xf32>
    %cst_11 = arith.constant dense<0.000000e+00> : vector<16x32xf32>
    %13 = tpu.matmul %10, %11, %cst_11 {dimension_numbers = #tpu.dot_dimension_numbers<[1], [0], [0], [1], [0, 0, 1, 1], [], []>} : vector<16x64xf32>, vector<64x32xf32>, vector<16x32xf32> -> vector<16x32xf32>
    %14 = arith.addf %12, %13 : vector<16x32xf32>
    %c0_12 = arith.constant 0 : index
    %c0_13 = arith.constant 0 : index
    %15 = vector.load %arg8[%c0_12, %c0_13] : memref<16x32xf32, #tpu.memory_space<vmem>>, vector<16x32xf32>
    tpu.vector_store %arg8[%c0_12, %c0_13], %14 {strides = array<i32>} : memref<16x32xf32, #tpu.memory_space<vmem>>, vector<16x32xf32>,
    %c0_i32_14 = arith.constant 0 : i32
    %16 = arith.cmpi eq, %arg1, %c0_i32_14 : i32
    %17 = arith.extui %16 : i1 to i32
    %c0_i32_15 = arith.constant 0 : i32
    %18 = arith.cmpi ne, %17, %c0_i32_15 : i32
    scf.if %18 {
      %c0_16 = arith.constant 0 : index
      %c0_17 = arith.constant 0 : index
      %19 = vector.load %arg6[%c0_16, %c0_17] : memref<5x32xf32, #tpu.memory_space<vmem>>, vector<5x32xf32>
      %c0_18 = arith.constant 0 : index
      %c0_19 = arith.constant 0 : index
      %20 = vector.load %arg8[%c0_18, %c0_19] : memref<16x32xf32, #tpu.memory_space<vmem>>, vector<16x32xf32>
      %21 = vector.extract_strided_slice %19 {offsets = [0, 0], sizes = [1, 32], strides = [1, 1]} : vector<5x32xf32> to vector<1x32xf32>
      %22 = vector.broadcast %21 : vector<1x32xf32> to vector<16x32xf32>
      %23 = arith.addf %20, %22 : vector<16x32xf32>
      %cst_20 = arith.constant dense<0.000000e+00> : vector<16xf32>
      %24 = vector.multi_reduction <add>, %23, %cst_20 [1] : vector<16x32xf32> to vector<16xf32>
      %25 = vector.shape_cast %24 : vector<16xf32> to vector<16x1xf32>
      %cst_21 = arith.constant 3.125000e-02 : f32
      %26 = vector.broadcast %cst_21 : f32 to vector<16x1xf32>
      %27 = arith.mulf %25, %26 : vector<16x1xf32>
      %28 = vector.broadcast %27 : vector<16x1xf32> to vector<16x32xf32>
      %29 = arith.subf %23, %28 : vector<16x32xf32>
      %30 = arith.mulf %29, %29 : vector<16x32xf32>
      %cst_22 = arith.constant dense<0.000000e+00> : vector<16xf32>
      %31 = vector.multi_reduction <add>, %30, %cst_22 [1] : vector<16x32xf32> to vector<16xf32>
      %32 = vector.shape_cast %31 : vector<16xf32> to vector<16x1xf32>
      %cst_23 = arith.constant 3.125000e-02 : f32
      %33 = vector.broadcast %cst_23 : f32 to vector<16x1xf32>
      %34 = arith.mulf %32, %33 : vector<16x1xf32>
      %cst_24 = arith.constant 9.99999974E-6 : f32
      %35 = vector.broadcast %cst_24 : f32 to vector<16x1xf32>
      %36 = arith.addf %34, %35 : vector<16x1xf32>
      %37 = math.rsqrt %36 : vector<16x1xf32>
      %38 = vector.broadcast %37 : vector<16x1xf32> to vector<16x32xf32>
      %39 = arith.mulf %29, %38 : vector<16x32xf32>
      %40 = vector.extract_strided_slice %19 {offsets = [1, 0], sizes = [1, 32], strides = [1, 1]} : vector<5x32xf32> to vector<1x32xf32>
      %41 = vector.broadcast %40 : vector<1x32xf32> to vector<16x32xf32>
      %42 = arith.mulf %39, %41 : vector<16x32xf32>
      %43 = vector.extract_strided_slice %19 {offsets = [2, 0], sizes = [1, 32], strides = [1, 1]} : vector<5x32xf32> to vector<1x32xf32>
      %44 = vector.broadcast %43 : vector<1x32xf32> to vector<16x32xf32>
      %45 = arith.addf %42, %44 : vector<16x32xf32>
      %cst_25 = arith.constant dense<0.000000e+00> : vector<16xf32>
      %46 = vector.multi_reduction <add>, %45, %cst_25 [1] : vector<16x32xf32> to vector<16xf32>
      %47 = vector.shape_cast %46 : vector<16xf32> to vector<16x1xf32>
      %cst_26 = arith.constant 3.125000e-02 : f32
      %48 = vector.broadcast %cst_26 : f32 to vector<16x1xf32>
      %49 = arith.mulf %47, %48 : vector<16x1xf32>
      %50 = vector.broadcast %49 : vector<16x1xf32> to vector<16x32xf32>
      %51 = arith.subf %45, %50 : vector<16x32xf32>
      %52 = arith.mulf %51, %51 : vector<16x32xf32>
      %cst_27 = arith.constant dense<0.000000e+00> : vector<16xf32>
      %53 = vector.multi_reduction <add>, %52, %cst_27 [1] : vector<16x32xf32> to vector<16xf32>
      %54 = vector.shape_cast %53 : vector<16xf32> to vector<16x1xf32>
      %cst_28 = arith.constant 3.125000e-02 : f32
      %55 = vector.broadcast %cst_28 : f32 to vector<16x1xf32>
      %56 = arith.mulf %54, %55 : vector<16x1xf32>
      %cst_29 = arith.constant 9.99999974E-6 : f32
      %57 = vector.broadcast %cst_29 : f32 to vector<16x1xf32>
      %58 = arith.addf %56, %57 : vector<16x1xf32>
      %59 = math.rsqrt %58 : vector<16x1xf32>
      %60 = vector.broadcast %59 : vector<16x1xf32> to vector<16x32xf32>
      %61 = arith.mulf %51, %60 : vector<16x32xf32>
      %62 = vector.extract_strided_slice %19 {offsets = [3, 0], sizes = [1, 32], strides = [1, 1]} : vector<5x32xf32> to vector<1x32xf32>
      %63 = vector.broadcast %62 : vector<1x32xf32> to vector<16x32xf32>
      %64 = arith.mulf %61, %63 : vector<16x32xf32>
      %65 = vector.extract_strided_slice %19 {offsets = [4, 0], sizes = [1, 32], strides = [1, 1]} : vector<5x32xf32> to vector<1x32xf32>
      %66 = vector.broadcast %65 : vector<1x32xf32> to vector<16x32xf32>
      %67 = arith.addf %64, %66 : vector<16x32xf32>
      %c0_30 = arith.constant 0 : index
      %c0_31 = arith.constant 0 : index
      %68 = vector.load %arg7[%c0_30, %c0_31] : memref<16x32xf32, #tpu.memory_space<vmem>>, vector<16x32xf32>
      tpu.vector_store %arg7[%c0_30, %c0_31], %67 {strides = array<i32>} : memref<16x32xf32, #tpu.memory_space<vmem>>, vector<16x32xf32>,
    } else {
    }
    return
  }
  func.func @transform_0(%arg0: i32, %arg1: i32) -> (i32, i32) {
    %c0_i32 = arith.constant 0 : i32
    %c0_i32_0 = arith.constant 0 : i32
    return %arg0, %c0_i32 : i32, i32
  }
  func.func @transform_1(%arg0: i32, %arg1: i32) -> (i32, i32) {
    %c0_i32 = arith.constant 0 : i32
    %c0_i32_0 = arith.constant 0 : i32
    return %c0_i32, %arg1 : i32, i32
  }
  func.func @transform_2(%arg0: i32, %arg1: i32) -> (i32, i32) {
    %c0_i32 = arith.constant 0 : i32
    %c0_i32_0 = arith.constant 0 : i32
    return %c0_i32, %arg1 : i32, i32
  }
  func.func @transform_3(%arg0: i32, %arg1: i32) -> (i32, i32) {
    %c0_i32 = arith.constant 0 : i32
    %c0_i32_0 = arith.constant 0 : i32
    return %arg1, %c0_i32 : i32, i32
  }
  func.func @transform_4(%arg0: i32, %arg1: i32) -> (i32, i32) {
    %c0_i32 = arith.constant 0 : i32
    %c0_i32_0 = arith.constant 0 : i32
    %c0_i32_1 = arith.constant 0 : i32
    return %c0_i32, %c0_i32_0 : i32, i32
  }
  func.func @transform_5(%arg0: i32, %arg1: i32) -> (i32, i32) {
    %c0_i32 = arith.constant 0 : i32
    %c0_i32_0 = arith.constant 0 : i32
    return %arg0, %c0_i32 : i32, i32
  }
}

</mosaic_0001>

<bundles_post_ra>
// kernel: tpu_custom_call.1
= control target key start
LH: loop header
LB: loop body
LE: loop exit
PB: predicated region body
PF: predicated region fallthrough
CT: control target
= control target key end

     0   :  { %vm25_vm0 = vcmask 261120   ;;  %s562_s0 = inlined_call_operand.vmem [shape: f32[16,32], index: 0, kind: input, shape index: {}]   ;;  %s563_s1 = inlined_call_operand.vmem [shape: f32[32,64], index: 1, kind: input, shape index: {}]   ;;  %s564_s2 = inlined_call_operand.vmem [shape: f32[1,64], index: 2, kind: input, shape index: {}]   ;;  %s565_s3 = inlined_call_operand.vmem [shape: f32[64,32], index: 3, kind: input, shape index: {}]   ;;  %s566_s4 = inlined_call_operand.vmem [shape: f32[5,32], index: 4, kind: input, shape index: {}]   ;;  %s567_s5 = inlined_call_operand.hbm [shape: f32[16,32], index: 5, kind: output, shape index: {}]  }
   0x1   :  { %v30_v0 = vld [vmem:[%s563_s1] sm:$0xff]  ;;  %v31_v1 = vld [vmem:[%s563_s1 + $0x8] sm:$0xff]  ;;  %v32_v2 = vld [vmem:[%s563_s1 + $0x10] sm:$0xff] }
   0x2   :  { %v378_v3 = vpack.c.bf16 %v31_v1, %v30_v0  ;;  %v33_v4 = vld [vmem:[%s563_s1 + $0x18] sm:$0xff]  ;;  %v28_v5 = vld [vmem:[%s562_s0] sm:$0xff]  ;;  %v126_v8 = vld [vmem:[%s565_s3 + $0x8] sm:$0xff] }
   0x3   :  { %v382_v6 = vpack.c.bf16 %v33_v4, %v32_v2  ;;  %356 = vmatprep.mubr.msk.f32.mxu0 %vm25_vm0, %v28_v5  ;;  %v125_v7 = vld [vmem:[%s565_s3] sm:$0xff]  ;;  %v127_v9 = vld [vmem:[%s565_s3 + $0x10] sm:$0xff]  ;;  %v128_v11 = vld [vmem:[%s565_s3 + $0x18] sm:$0xff] }
   0x4   :  { %379 = vmatprep.subr.bf16.mxu0 %v378_v3  ;;  %v386_v10 = vpack.c.bf16 %v126_v8, %v125_v7  ;;  %v390_v12 = vpack.c.bf16 %v128_v11, %v127_v9  ;;  %v129_v13 = vld [vmem:[%s565_s3 + $0x20] sm:$0xff]  ;;  %v130_v14 = vld [vmem:[%s565_s3 + $0x28] sm:$0xff] }
   0x5   :  { %381 = vmatpush3.bf16.msra.mxu0 %v378_v3 }
   0x6   :  { %10 = vsyncpa [#allocation4], 0  ;;  %383 = vmatprep.subr.bf16.mxu0 %v382_v6  ;;  %387 = vmatprep.subr.bf16.mxu1 %v386_v10  ;;  %v394_v15 = vpack.c.bf16 %v130_v14, %v129_v13  ;;  %v29_v16 = vld [vmem:[%s562_s0 + $0x8] sm:$0xff]  ;;  %v131_v17 = vld [vmem:[%s565_s3 + $0x30] sm:$0xff]  ;;  %v438_v20 = vmov 0.0   ;;  %vm135_vm1 = vcmask 523264   ;;  %v227_v28 = vlaneseq }
   0x7   :  { %389 = vmatpush3.bf16.msra.mxu1 %v386_v10  ;;  %v132_v18 = vld [vmem:[%s565_s3 + $0x38] sm:$0xff]  ;;  %27 = vst.msk [vmem:[#allocation2 + $0x8] sm:$0xff] %vm25_vm0, %v438_v20  ;;  %26 = vst.msk [vmem:[#allocation2] sm:$0xff] %vm25_vm0, %v438_v20  ;;  %v327_v21 = vld [vmem:[%s564_s2] ss:$0 sm:$0xff] }
   0x8   :  { %391 = vmatprep.subr.bf16.mxu1 %v390_v12  ;;  %v398_v19 = vpack.c.bf16 %v132_v18, %v131_v17  ;;  %v521_v32 = vshrl.u32 %v227_v28, 7  ;;  %v529_v37 = vld [vmem:[%s566_s4] sm:$0x1f]  ;;  %s439_s4 = smov [#allocation3]  }
   0x9   :  { %385 = vmatpush3.bf16.msra.mxu0 %v382_v6  ;;  %s316_s21 = sshll.u32 %s439_s4, 4  ;;  %s317_s21 = int_to_ptr.vmem [resolvable:$true] %s316_s21 }
   0xa   :  { %v229_v36 = vsub.s32 0, %v521_v32  ;;  %v261_v61 = vsub.s32 1, %v521_v32  ;;  %v267_v62 = vsub.s32 2, %v521_v32  ;;  %v305_v28 = vsub.s32 4, %v521_v32  ;;  %s414_s22 = scalar_lea.vmem %s317_s21, 256  ;;  %p419_p1 = scmp.lt.s32.totalorder %s317_s21, %s317_s21 }
   0xb   :  { %393 = vmatpush3.bf16.msra.mxu1 %v390_v12  ;;  %p415_p0 = scmp.ne.s32.totalorder %s317_s21, %s414_s22  ;;  %p420_p2 = scmp.lt.s32.totalorder %s414_s22, %s414_s22 }
   0xc   :  { %357 = vmatmul.mubr.msk.f32.vlgmr.msra.gmra.mrb[0].mxu0 %vm25_vm0, %v29_v16  ;;  %395 = vmatprep.subr.bf16.mxu1 %v394_v15  ;;  %v230_v38 = vrot.slane %v529_v37, %v229_v36  ;;  %v262_v63 = vrot.slane %v529_v37, %v261_v61  ;;  %v268_v2 = vrot.slane %v529_v37, %v267_v62 }
   0xd   :  { %p421_p3 = por %p420_p2, %p419_p1 }
   0xe   :  { %v134_v29 = vld [vmem:[#allocation2 + $0x8] sm:$0xff]  ;;  %v133_v30 = vld [vmem:[#allocation2] sm:$0xff] }
   0xf   :  { %397 = vmatpush3.bf16.msra.mxu1 %v394_v15  ;;  %p422_p4 = pnand %p421_p3, %p415_p0 }
  0x10   :  { %399 = vmatprep.subr.bf16.mxu1 %v398_v19 }
  0x13   :  { %401 = vmatpush3.bf16.msra.mxu1 %v398_v19 }
  0xdf   :  { %v358_v22 = vpop.f32.mrb[0].mxu0 }
  0xe0   :  { %v120_v23 = vadd.f32 %v358_v22, %v327_v21  ;;  %v114_v24 = vpop.f32.mrb[1].mxu0 }
  0xe1   :  { %v115_v25 = vadd.f32 %v327_v21, %v114_v24 }
  0xe2   :  { %v124_v27 = vmax.f32 %v120_v23, 0.0 }
  0xe3   :  { %v123_v26 = vmax.f32 %v115_v25, 0.0 }
  0xe5   :  { %375 = vmatprep.mubr.msk.f32.mxu1 %vm135_vm1, %v123_v26 }
  0xe6   :  { %376 = vmatmul.mubr.msk.f32.vlgmr.msra.gmra.mrb[0].mxu1 %vm135_vm1, %v124_v27  ;;  %v299_v27 = vsub.s32 3, %v521_v32 }
 0x1b9   :  { %v377_v31 = vpop.f32.mrb[0].mxu1 }
 0x1ba   :  { %v218_v33 = vadd.f32 %v377_v31, %v134_v29  ;;  %v208_v34 = vpop.f32.mrb[1].mxu1  ;;  %v300_v29 = vrot.slane %v529_v37, %v299_v27 }
 0x1bb   :  { %v217_v35 = vadd.f32 %v208_v34, %v133_v30 }
 0x1bc   :  { %220 = vst.msk [vmem:[#allocation2 + $0x8] sm:$0xff] %vm25_vm0, %v218_v33  ;;  %v306_v33 = vrot.slane %v529_v37, %v305_v28 }
 0x1bd   :  { %219 = vst.msk [vmem:[#allocation2] sm:$0xff] %vm25_vm0, %v217_v35 }
 0x1c3   :  { %v226_v40 = vld [vmem:[#allocation2 + $0x8] sm:$0xff] }
 0x1c4   :  { %v225_v39 = vld [vmem:[#allocation2] sm:$0xff]  ;;  %v232_v43 = vadd.f32 %v230_v38, %v226_v40 }
 0x1c5   :  { %v231_v41 = vadd.f32 %v230_v38, %v225_v39 }
 0x1c6   :  { %v236_v44 = vsel %vm25_vm0, %v232_v43, 0.0 }
 0x1c7   :  { %v233_v42 = vsel %vm25_vm0, %v231_v41, 0.0 }
 0x1c8   :  { %234 = vadd.xlane.f32.xlu0 %v233_v42 }
 0x1cc   :  { %237 = vadd.xlane.f32.xlu0 %v236_v44 }
 0x255   :  { %v235_v45 = vpop.xlane.xlu0 %234 }
 0x256   :  { %v239_v46 = vmul.f32 0.03125, %v235_v45 }
 0x258   :  { %v241_v47 = vsub.f32 %v231_v41, %v239_v46 }
 0x259   :  { %v238_v48 = vpop.xlane.xlu0 %237 }
 0x25a   :  { %v240_v49 = vmul.f32 0.03125, %v238_v48  ;;  %v243_v50 = vmul.f32 %v241_v47, %v241_v47 }
 0x25c   :  { %v242_v51 = vsub.f32 %v232_v43, %v240_v49  ;;  %v245_v52 = vsel %vm25_vm0, %v243_v50, 0.0 }
 0x25d   :  { %246 = vadd.xlane.f32.xlu1 %v245_v52 }
 0x25e   :  { %v244_v53 = vmul.f32 %v242_v51, %v242_v51 }
 0x260   :  { %v248_v54 = vsel %vm25_vm0, %v244_v53, 0.0 }
 0x261   :  { %249 = vadd.xlane.f32.xlu1 %v248_v54 }
 0x2ea   :  { %v247_v55 = vpop.xlane.xlu1 %246 }
 0x2eb   :  { %v251_v56 = vmul.f32 0.03125, %v247_v55 }
 0x2ed   :  { %v253_v57 = vadd.f32 1e-05, %v251_v56 }
 0x2ee   :  { %v250_v58 = vpop.xlane.xlu1 %249 }
 0x2ef   :  { %406 = vrsqrt.f32 %v253_v57  ;;  %v252_v59 = vmul.f32 0.03125, %v250_v58 }
 0x2f1   :  { %v254_v60 = vadd.f32 1e-05, %v252_v59 }
 0x2f3   :  { %408 = vrsqrt.f32 %v254_v60 }
 0x2f9   :  { %v407_v0 = vpop.eup %406 }
 0x2fa   :  { %v257_v1 = vmul.f32 %v407_v0, %v241_v47 }
 0x2fc   :  { %v263_v3 = vmul.f32 %v262_v63, %v257_v1 }
 0x2fd   :  { %v409_v4 = vpop.eup %408 }
 0x2fe   :  { %v269_v5 = vadd.f32 %v268_v2, %v263_v3  ;;  %v258_v6 = vmul.f32 %v409_v4, %v242_v51 }
 0x300   :  { %v271_v7 = vsel %vm25_vm0, %v269_v5, 0.0  ;;  %v264_v8 = vmul.f32 %v262_v63, %v258_v6 }
 0x301   :  { %272 = vadd.xlane.f32.xlu0 %v271_v7 }
 0x302   :  { %v270_v9 = vadd.f32 %v268_v2, %v264_v8 }
 0x304   :  { %v274_v10 = vsel %vm25_vm0, %v270_v9, 0.0 }
 0x305   :  { %275 = vadd.xlane.f32.xlu1 %v274_v10 }
 0x38e   :  { %v273_v11 = vpop.xlane.xlu0 %272 }
 0x38f   :  { %v277_v12 = vmul.f32 0.03125, %v273_v11 }
 0x391   :  { %v279_v13 = vsub.f32 %v269_v5, %v277_v12 }
 0x392   :  { %v276_v14 = vpop.xlane.xlu1 %275 }
 0x393   :  { %v278_v15 = vmul.f32 0.03125, %v276_v14  ;;  %v281_v16 = vmul.f32 %v279_v13, %v279_v13 }
 0x395   :  { %v280_v17 = vsub.f32 %v270_v9, %v278_v15  ;;  %v283_v18 = vsel %vm25_vm0, %v281_v16, 0.0 }
 0x396   :  { %284 = vadd.xlane.f32.xlu0 %v283_v18 }
 0x397   :  { %v282_v19 = vmul.f32 %v280_v17, %v280_v17 }
 0x399   :  { %v286_v20 = vsel %vm25_vm0, %v282_v19, 0.0 }
 0x39a   :  { %287 = vadd.xlane.f32.xlu1 %v286_v20 }
 0x423   :  { %v285_v21 = vpop.xlane.xlu0 %284 }
 0x424   :  { %v289_v22 = vmul.f32 0.03125, %v285_v21 }
 0x426   :  { %v291_v23 = vadd.f32 1e-05, %v289_v22 }
 0x427   :  { %v288_v24 = vpop.xlane.xlu1 %287 }
 0x428   :  { %410 = vrsqrt.f32 %v291_v23  ;;  %v290_v25 = vmul.f32 0.03125, %v288_v24 }
 0x42a   :  { %v292_v26 = vadd.f32 1e-05, %v290_v25 }
 0x42c   :  { %412 = vrsqrt.f32 %v292_v26 }
 0x432   :  { %v411_v30 = vpop.eup %410 }
 0x433   :  { %v295_v31 = vmul.f32 %v411_v30, %v279_v13 }
 0x435   :  { %v301_v34 = vmul.f32 %v300_v29, %v295_v31 }
 0x436   :  { %v413_v35 = vpop.eup %412 }
 0x437   :  { %v296_v36 = vmul.f32 %v413_v35, %v280_v17  ;;  %v307_v38 = vadd.f32 %v306_v33, %v301_v34 }
 0x439   :  { %v302_v39 = vmul.f32 %v300_v29, %v296_v36  ;;  %309 = vst.msk [vmem:[#allocation3] sm:$0xff] %vm25_vm0, %v307_v38 }
 0x43b   :  { %v308_v40 = vadd.f32 %v306_v33, %v302_v39 }
 0x43d   :  { %310 = vst.msk [vmem:[#allocation3 + $0x8] sm:$0xff] %vm25_vm0, %v308_v40 }
 0x43e   :  { %425 = shalt.err (!%p422_p4)
}
 0x43f   :  { %s426_s25 = scalar_lea.hbm %s567_s5, 256 }
 0x440   :  { %p427_p5 = scmp.ne.s32.totalorder %s567_s5, %s426_s25  ;;  %p430_p6 = scmp.lt.u32.totalorder %s426_s25, %s567_s5 }
 0x442   :  { %p432_p7 = pnand %p430_p6, %p427_p5 }
 0x444   :  { %435 = shalt.err (!%p432_p7)
}
 0x445   :  { %s440_s30 = smov 128   ;;  %s441_s6 = smov 8  }
 0x446   :  { %322 = dma.vmem_to_hbm [thread:$0]  %s317_s21, 256, %s567_s5, [#allocation4], %s440_s30, %s440_s30, %s441_s6  }
 0x447   :  { %436 = dma.done.wait [#allocation4], 256  }
 0x448   :  { %437 = vsyncadd [#allocation4], 4294967040 }
 0x449   :  { %326 = vsyncpa [#allocation4], 1 }

</bundles_post_ra>
